<compile_context>
chip_gen: v7x
topology: tpu7x:2x2x1
jax: 0.10.0
libtpu: 0.0.40
codegen_flags: <defaults>
</compile_context>

<pallas_src>
import jax
import jax.numpy as jnp
from jax.experimental import pallas as pl
from jax.experimental.pallas import tpu as pltpu


# --------------------------- hardware / budgets -----------------------------

def _round_up(x, m):
    return ((x + m - 1) // m) * m


def _vmem_capacity_bytes():
    try:
        return int(pltpu.get_tpu_info().vmem_capacity_bytes)
    except Exception:
        return 64 << 20          # assume v7x-sized VMEM if the query fails


def _working_set_budget(vmem_cap):
    # Target bytes of kernel VMEM working set (double-buffered output block,
    # f32 intermediates, input/weight blocks).
    if vmem_cap >= (96 << 20):   # v5e / v6e: 128 MiB VMEM
        return 56 << 20
    return 26 << 20              # v7x: 64 MiB VMEM


# Device-independent cap on the (double-buffered) selector-matrix allocation so
# the flat-vs-padded path choice does not depend on the TPU generation.
_FLAT_E_ALLOC_CAP = 8 << 20


# ----------------------------- tile selection -------------------------------

def _batch_tile_cands(batch):
    bp8 = _round_up(max(batch, 1), 8)
    return sorted({t for t in range(8, bp8 + 1, 8) if bp8 % t == 0},
                  reverse=True)


def _pick_flat_tb(batch, d, in1, in2, itemsize, total_cap, e_alloc_bytes):
    """Batch tile for the flat path: largest multiple of 8 dividing the
    8-padded batch whose VMEM working set stays under `total_cap`."""
    in1p = _round_up(in1, 128)
    in2p = _round_up(in2, 128)
    dd = _round_up(d * d, 128)
    fixed = e_alloc_bytes + 2 * 4 * ((in1p + in2p) * _round_up(d, 128)
                                     + 2 * 8 * _round_up(d, 128))
    per_row = (2 * itemsize + 2 * 4) * dd + 2 * 4 * (in1p + in2p)
    cands = _batch_tile_cands(batch)
    tb = next((t for t in cands if fixed + t * per_row <= total_cap), 8)
    return tb, fixed + tb * per_row


def _pick_3d_tiles(d_p, batch, in1, in2, itemsize, total_cap):
    tiles = [t for t in range(128, d_p + 1, 128) if d_p % t == 0]
    in1p = _round_up(in1, 128)
    in2p = _round_up(in2, 128)

    def block_bytes(tb, ti, tj):
        return ((2 * itemsize + 4) * tb * ti * tj          # out (x2 buf) + f32 product
                + 2 * 4 * tb * (in1p + in2p)               # x1/x2 blocks (x2 buf)
                + 2 * 4 * (in1 * ti + in2 * tj + ti + tj)  # weight/bias blocks
                + 4 * 8 * (ti + tj))                       # p1/p2 projections

    tj = max([t for t in tiles if block_bytes(8, tiles[0], t) <= total_cap]
             or tiles[:1])
    ti = max([t for t in tiles if block_bytes(8, t, tj) <= total_cap]
             or tiles[:1])
    cands = _batch_tile_cands(batch)
    tb = next((t for t in cands if block_bytes(t, ti, tj) <= total_cap), 8)
    return tb, ti, tj, block_bytes


# -------------------------------- kernels -----------------------------------

def _flat_kernel(x1_ref, x2_ref, w1t_ref, b1_ref, w2t_ref, b2_ref,
                 e1_ref, e2_ref, out_ref):
    f32 = jnp.float32
    # Small projections on the MXU (weights are the ordinary (in, D) matrices;
    # their block index never changes so they are fetched into VMEM once).
    p1 = jnp.dot(x1_ref[...], w1t_ref[...], preferred_element_type=f32) + b1_ref[...]
    p2 = jnp.dot(x2_ref[...], w2t_ref[...], preferred_element_type=f32) + b2_ref[...]
    # Lane-dense expansion via constant 0/1 selectors (exact, MXU-only):
    #   p1e[b, i*D + j] = p1[b, i]     p2e[b, i*D + j] = p2[b, j]
    p1e = jnp.dot(p1, e1_ref[...], preferred_element_type=f32)
    p2e = jnp.dot(p2, e2_ref[...], preferred_element_type=f32)
    out_ref[...] = (p1e * p2e).astype(out_ref.dtype)


def _tiled3d_kernel(x1_ref, x2_ref, w1t_ref, b1_ref, w2t_ref, b2_ref, out_ref):
    f32 = jnp.float32
    p1 = jnp.dot(x1_ref[...], w1t_ref[...], preferred_element_type=f32) + b1_ref[...]
    p2 = jnp.dot(x2_ref[...], w2t_ref[...], preferred_element_type=f32) + b2_ref[...]
    out_ref[...] = (p1[:, :, None] * p2[:, None, :]).astype(out_ref.dtype)


# -------------------------------- wrappers -----------------------------------

def _bilinear_flat(x1, x2, w1t, b1, w2t, b2, tb, out_dtype, vmem_cap, total_cap):
    batch, in1 = x1.shape
    in2 = x2.shape[1]
    d = w1t.shape[1]
    itemsize = jnp.dtype(out_dtype).itemsize
    e_alloc = 2 * 2 * d * d * d * 4     # E1 + E2, double-buffered, f32

    auto_tb, est = _pick_flat_tb(batch, d, in1, in2, itemsize, total_cap, e_alloc)
    if tb is None:
        tb = auto_tb
    else:
        assert tb % 8 == 0, tb
        _, est = _pick_flat_tb(batch, d, in1, in2, itemsize, total_cap, e_alloc)
    bp = _round_up(batch, tb)
    if bp != batch:
        x1 = jnp.pad(x1, ((0, bp - batch), (0, 0)))
        x2 = jnp.pad(x2, ((0, bp - batch), (0, 0)))

    # Constant 0/1 selector matrices for the lane-dense expansion.
    #   e1[i, i*D + j] = 1        e2[j, i*D + j] = 1
    # TODO(synk): cache e1/e2 (and the transposed weights) alongside the layer
    # parameters if the layer is called repeatedly; they are tiny but are
    # rebuilt by XLA on every call here.
    col = jnp.arange(d * d, dtype=jnp.int32)[None, :]
    row = jnp.arange(d, dtype=jnp.int32)[:, None]
    e1 = (col // d == row).astype(jnp.float32)
    e2 = (col % d == row).astype(jnp.float32)

    vmem_limit = int(min(0.85 * vmem_cap, max(32 << 20, 1.25 * est)))

    flops = 2 * bp * d * (in1 + in2) + 4 * bp * d * d * d + bp * d * d
    bytes_accessed = (4 * (bp * (in1 + in2) + (in1 + in2) * d + 2 * d
                           + 2 * d * d * d)
                      + bp * d * d * itemsize)

    out = pl.pallas_call(
        _flat_kernel,
        out_shape=jax.ShapeDtypeStruct((bp, d * d), out_dtype),
        grid=(bp // tb,),
        in_specs=[
            pl.BlockSpec((tb, in1), lambda b: (b, 0)),
            pl.BlockSpec((tb, in2), lambda b: (b, 0)),
            pl.BlockSpec((in1, d), lambda b: (0, 0)),
            pl.BlockSpec((1, d), lambda b: (0, 0)),
            pl.BlockSpec((in2, d), lambda b: (0, 0)),
            pl.BlockSpec((1, d), lambda b: (0, 0)),
            pl.BlockSpec((d, d * d), lambda b: (0, 0)),
            pl.BlockSpec((d, d * d), lambda b: (0, 0)),
        ],
        out_specs=pl.BlockSpec((tb, d * d), lambda b: (b, 0)),
        compiler_params=pltpu.CompilerParams(
            # TODO(synk): on v7x, pltpu.CORE_PARALLEL on this axis guarantees
            # the batch sweep is split across both TensorCores.
            dimension_semantics=("parallel",),
            vmem_limit_bytes=vmem_limit),
        cost_estimate=pl.CostEstimate(flops=flops, transcendentals=0,
                                      bytes_accessed=bytes_accessed),
    )(x1, x2, w1t, b1.reshape(1, d), w2t, b2.reshape(1, d), e1, e2)
    return out.reshape(bp, d, d)[:batch]


def _bilinear_3d(x1, x2, w1t, b1, w2t, b2, d, tb, ti, tj, out_dtype,
                 vmem_cap, total_cap):
    batch, in1 = x1.shape
    in2 = x2.shape[1]
    itemsize = jnp.dtype(out_dtype).itemsize
    d_p = _round_up(d, 128)

    a_tb, a_ti, a_tj, block_bytes = _pick_3d_tiles(
        d_p, batch, in1, in2, itemsize, total_cap)
    ti = a_ti if ti is None else ti
    tj = a_tj if tj is None else tj
    tb = a_tb if tb is None else tb
    assert tb % 8 == 0, tb
    assert d_p % ti == 0 and ti % 128 == 0, (d_p, ti)
    assert d_p % tj == 0 and tj % 128 == 0, (d_p, tj)
    bp = _round_up(batch, tb)

    if bp != batch:
        x1 = jnp.pad(x1, ((0, bp - batch), (0, 0)))
        x2 = jnp.pad(x2, ((0, bp - batch), (0, 0)))
    if d_p != d:
        # Padded projection columns are exactly zero -> zero rows/cols in the
        # outer product; sliced off below (exact, no numerical effect).
        w1t = jnp.pad(w1t, ((0, 0), (0, d_p - d)))
        w2t = jnp.pad(w2t, ((0, 0), (0, d_p - d)))
        b1 = jnp.pad(b1, (0, d_p - d))
        b2 = jnp.pad(b2, (0, d_p - d))

    est = block_bytes(tb, ti, tj)
    vmem_limit = int(min(0.85 * vmem_cap, max(32 << 20, 1.25 * est)))

    flops = 2 * bp * d_p * (in1 + in2) + bp * d_p * d_p
    bytes_accessed = (4 * (bp * (in1 + in2) + (in1 + in2) * d_p + 2 * d_p)
                      + bp * d_p * d_p * itemsize)

    out = pl.pallas_call(
        _tiled3d_kernel,
        out_shape=jax.ShapeDtypeStruct((bp, d_p, d_p), out_dtype),
        grid=(bp // tb, d_p // ti, d_p // tj),
        in_specs=[
            pl.BlockSpec((tb, in1), lambda b, i, j: (b, 0)),
            pl.BlockSpec((tb, in2), lambda b, i, j: (b, 0)),
            pl.BlockSpec((in1, ti), lambda b, i, j: (0, i)),
            pl.BlockSpec((1, ti), lambda b, i, j: (0, i)),
            pl.BlockSpec((in2, tj), lambda b, i, j: (0, j)),
            pl.BlockSpec((1, tj), lambda b, i, j: (0, j)),
        ],
        out_specs=pl.BlockSpec((tb, ti, tj), lambda b, i, j: (b, i, j)),
        compiler_params=pltpu.CompilerParams(
            # TODO(synk): pltpu.CORE_PARALLEL on the batch axis for v7x.
            dimension_semantics=("parallel", "parallel", "parallel"),
            vmem_limit_bytes=vmem_limit),
        cost_estimate=pl.CostEstimate(flops=flops, transcendentals=0,
                                      bytes_accessed=bytes_accessed),
    )(x1, x2, w1t, b1.reshape(1, d_p), w2t, b2.reshape(1, d_p))
    return out[:batch, :d, :d]


def bilinear_pooling(x1, x2, w1, b1, w2, b2, *, tb=None, ti=None, tj=None,
                     out_dtype=None):
    """BilinearPooling forward.

    x1: (B, in1), x2: (B, in2); w1: (D, in1), b1: (D,); w2: (D, in2), b2: (D,).
    Returns squeeze(outer(fc1(x1), fc2(x2))): (B, D, D) for B, D > 1 (like
    torch's .squeeze(), unit dims are dropped).  Pass out_dtype=jnp.bfloat16
    to halve the dominant (B, D, D) HBM writeback when the consumer allows it.
    """
    batch, in1 = x1.shape
    batch2, in2 = x2.shape
    assert batch == batch2, (batch, batch2)
    d = w1.shape[0]
    assert w1.shape == (d, in1) and w2.shape == (d, in2), (w1.shape, w2.shape)
    assert b1.shape == (d,) and b2.shape == (d,), (b1.shape, b2.shape)
    out_dtype = x1.dtype if out_dtype is None else jnp.dtype(out_dtype)

    vmem_cap = _vmem_capacity_bytes()
    total_cap = _working_set_budget(vmem_cap)

    f32 = jnp.float32
    x1f = x1.astype(f32)
    x2f = x2.astype(f32)
    w1t = w1.T.astype(f32)
    w2t = w2.T.astype(f32)
    b1f = b1.astype(f32)
    b2f = b2.astype(f32)

    # Lane-dense flattened path for D that is not a multiple of 128 and small
    # enough that the (D, D*D) selector matrices stay cheap; otherwise the
    # (tb, ti, tj)-tiled 3-D path (zero-padding D up to a multiple of 128 when
    # needed, which is already lane-dense).
    e_alloc = 2 * 2 * d * d * d * 4
    if (d % 128 != 0) and (e_alloc <= _FLAT_E_ALLOC_CAP):
        out = _bilinear_flat(x1f, x2f, w1t, b1f, w2t, b2f, tb, out_dtype,
                             vmem_cap, total_cap)
    else:
        out = _bilinear_3d(x1f, x2f, w1t, b1f, w2t, b2f, d, tb, ti, tj,
                           out_dtype, vmem_cap, total_cap)
    return jnp.squeeze(out)   # match torch's .squeeze()


# ------------------------------- reference ----------------------------------

def bilinear_pooling_ref(x1, x2, w1, b1, w2, b2):
    p1 = x1 @ w1.T + b1
    p2 = x2 @ w2.T + b2
    return jnp.squeeze(p1[:, :, None] * p2[:, None, :])


def _make_inputs(key, batch, in1, in2, d):
    k1, k2, k3, k4, k5, k6 = jax.random.split(key, 6)
    x1 = jax.random.normal(k1, (batch, in1), dtype=jnp.float32)
    x2 = jax.random.normal(k2, (batch, in2), dtype=jnp.float32)
    w1 = jax.random.normal(k3, (d, in1), dtype=jnp.float32) / jnp.sqrt(in1)
    b1 = jax.random.normal(k4, (d,), dtype=jnp.float32) * 0.01
    w2 = jax.random.normal(k5, (d, in2), dtype=jnp.float32) / jnp.sqrt(in2)
    b2 = jax.random.normal(k6, (d,), dtype=jnp.float32) * 0.01
    return x1, x2, w1, b1, w2, b2


if __name__ == "__main__":
    key = jax.random.PRNGKey(0)
    cases = [
        # (shapes, tiling overrides) -- small shapes implied by the module.
        (dict(batch=2, in1=4, in2=6, d=32), {}),                    # flat path, batch padded 2->8
        (dict(batch=16, in1=24, in2=40, d=32), dict(tb=8)),         # flat path, 2-step batch grid
        (dict(batch=16, in1=4, in2=6, d=256),
         dict(tb=8, ti=128, tj=128)),                               # 3-D path, 2x2x2 grid
        (dict(batch=8, in1=10, in2=12, d=96), {}),                  # padded 3-D path (96 -> 128)
    ]
    for idx, (shapes, tiles) in enumerate(cases):
        key, sub = jax.random.split(key)
        args = _make_inputs(sub, **shapes)
        out = jax.block_until_ready(bilinear_pooling(*args, **tiles))
        ref = bilinear_pooling_ref(*args)
        assert out.shape == ref.shape, (idx, out.shape, ref.shape)
        err = float(jnp.max(jnp.abs(out - ref)))
        assert jnp.allclose(out, ref, atol=1e-4, rtol=1e-4), (
            f"case {idx}: mismatch vs reference, max abs err {err}")
    print("KERNEL_OK")
</pallas_src>

<mosaic_0001>
module attributes {stable_mosaic.version = 11 : i64} {
  func.func @_flat_kernel(%arg0: i32, %arg1: memref<8x4xf32, #tpu.memory_space<vmem>>, %arg2: memref<8x6xf32, #tpu.memory_space<vmem>>, %arg3: memref<4x32xf32, #tpu.memory_space<vmem>>, %arg4: memref<1x32xf32, #tpu.memory_space<vmem>>, %arg5: memref<6x32xf32, #tpu.memory_space<vmem>>, %arg6: memref<1x32xf32, #tpu.memory_space<vmem>>, %arg7: memref<32x1024xf32, #tpu.memory_space<vmem>>, %arg8: memref<32x1024xf32, #tpu.memory_space<vmem>>, %arg9: memref<8x1024xf32, #tpu.memory_space<vmem>>) attributes {dimension_semantics = [#tpu.dimension_semantics<parallel>], iteration_bounds = array<i64: 1>, scalar_prefetch = 0 : i64, scratch_operands = 0 : i64, tpu.core_type = #tpu.core_type<tc>, window_params = [{transform_indices = @transform_0, window_bounds = array<i64: 8, 4>}, {transform_indices = @transform_1, window_bounds = array<i64: 8, 6>}, {pipeline_mode = #tpu.pipeline_mode<synchronous>, transform_indices = @transform_2, window_bounds = array<i64: 4, 32>}, {pipeline_mode = #tpu.pipeline_mode<synchronous>, transform_indices = @transform_3, window_bounds = array<i64: 1, 32>}, {pipeline_mode = #tpu.pipeline_mode<synchronous>, transform_indices = @transform_4, window_bounds = array<i64: 6, 32>}, {pipeline_mode = #tpu.pipeline_mode<synchronous>, transform_indices = @transform_5, window_bounds = array<i64: 1, 32>}, {pipeline_mode = #tpu.pipeline_mode<synchronous>, transform_indices = @transform_6, window_bounds = array<i64: 32, 1024>}, {pipeline_mode = #tpu.pipeline_mode<synchronous>, transform_indices = @transform_7, window_bounds = array<i64: 32, 1024>}, {transform_indices = @transform_8, window_bounds = array<i64: 8, 1024>}]} {
    %c0 = arith.constant 0 : index
    %c0_0 = arith.constant 0 : index
    %0 = vector.load %arg1[%c0, %c0_0] : memref<8x4xf32, #tpu.memory_space<vmem>>, vector<8x4xf32>
    %c0_1 = arith.constant 0 : index
    %c0_2 = arith.constant 0 : index
    %1 = vector.load %arg3[%c0_1, %c0_2] : memref<4x32xf32, #tpu.memory_space<vmem>>, vector<4x32xf32>
    %cst = arith.constant dense<0.000000e+00> : vector<8x32xf32>
    %2 = tpu.matmul %0, %1, %cst {dimension_numbers = #tpu.dot_dimension_numbers<[1], [0], [0], [1], [0, 0, 1, 1], [], []>} : vector<8x4xf32>, vector<4x32xf32>, vector<8x32xf32> -> vector<8x32xf32>
    %c0_3 = arith.constant 0 : index
    %c0_4 = arith.constant 0 : index
    %3 = vector.load %arg4[%c0_3, %c0_4] : memref<1x32xf32, #tpu.memory_space<vmem>>, vector<1x32xf32>
    %4 = vector.broadcast %3 : vector<1x32xf32> to vector<8x32xf32>
    %5 = arith.addf %2, %4 : vector<8x32xf32>
    %c0_5 = arith.constant 0 : index
    %c0_6 = arith.constant 0 : index
    %6 = vector.load %arg2[%c0_5, %c0_6] : memref<8x6xf32, #tpu.memory_space<vmem>>, vector<8x6xf32>
    %c0_7 = arith.constant 0 : index
    %c0_8 = arith.constant 0 : index
    %7 = vector.load %arg5[%c0_7, %c0_8] : memref<6x32xf32, #tpu.memory_space<vmem>>, vector<6x32xf32>
    %cst_9 = arith.constant dense<0.000000e+00> : vector<8x32xf32>
    %8 = tpu.matmul %6, %7, %cst_9 {dimension_numbers = #tpu.dot_dimension_numbers<[1], [0], [0], [1], [0, 0, 1, 1], [], []>} : vector<8x6xf32>, vector<6x32xf32>, vector<8x32xf32> -> vector<8x32xf32>
    %c0_10 = arith.constant 0 : index
    %c0_11 = arith.constant 0 : index
    %9 = vector.load %arg6[%c0_10, %c0_11] : memref<1x32xf32, #tpu.memory_space<vmem>>, vector<1x32xf32>
    %10 = vector.broadcast %9 : vector<1x32xf32> to vector<8x32xf32>
    %11 = arith.addf %8, %10 : vector<8x32xf32>
    %c0_12 = arith.constant 0 : index
    %c0_13 = arith.constant 0 : index
    %12 = vector.load %arg7[%c0_12, %c0_13] : memref<32x1024xf32, #tpu.memory_space<vmem>>, vector<32x1024xf32>
    %cst_14 = arith.constant dense<0.000000e+00> : vector<8x1024xf32>
    %13 = tpu.matmul %5, %12, %cst_14 {dimension_numbers = #tpu.dot_dimension_numbers<[1], [0], [0], [1], [0, 0, 1, 1], [], []>} : vector<8x32xf32>, vector<32x1024xf32>, vector<8x1024xf32> -> vector<8x1024xf32>
    %c0_15 = arith.constant 0 : index
    %c0_16 = arith.constant 0 : index
    %14 = vector.load %arg8[%c0_15, %c0_16] : memref<32x1024xf32, #tpu.memory_space<vmem>>, vector<32x1024xf32>
    %cst_17 = arith.constant dense<0.000000e+00> : vector<8x1024xf32>
    %15 = tpu.matmul %11, %14, %cst_17 {dimension_numbers = #tpu.dot_dimension_numbers<[1], [0], [0], [1], [0, 0, 1, 1], [], []>} : vector<8x32xf32>, vector<32x1024xf32>, vector<8x1024xf32> -> vector<8x1024xf32>
    %16 = arith.mulf %13, %15 : vector<8x1024xf32>
    %c0_18 = arith.constant 0 : index
    %c0_19 = arith.constant 0 : index
    %17 = vector.load %arg9[%c0_18, %c0_19] : memref<8x1024xf32, #tpu.memory_space<vmem>>, vector<8x1024xf32>
    tpu.vector_store %arg9[%c0_18, %c0_19], %16 {strides = array<i32>} : memref<8x1024xf32, #tpu.memory_space<vmem>>, vector<8x1024xf32>,
    return
  }
  func.func @transform_0(%arg0: i32) -> (i32, i32) {
    %c0_i32 = arith.constant 0 : i32
    %c0_i32_0 = arith.constant 0 : i32
    return %arg0, %c0_i32 : i32, i32
  }
  func.func @transform_1(%arg0: i32) -> (i32, i32) {
    %c0_i32 = arith.constant 0 : i32
    %c0_i32_0 = arith.constant 0 : i32
    return %arg0, %c0_i32 : i32, i32
  }
  func.func @transform_2(%arg0: i32) -> (i32, i32) {
    %c0_i32 = arith.constant 0 : i32
    %c0_i32_0 = arith.constant 0 : i32
    %c0_i32_1 = arith.constant 0 : i32
    return %c0_i32, %c0_i32_0 : i32, i32
  }
  func.func @transform_3(%arg0: i32) -> (i32, i32) {
    %c0_i32 = arith.constant 0 : i32
    %c0_i32_0 = arith.constant 0 : i32
    %c0_i32_1 = arith.constant 0 : i32
    return %c0_i32, %c0_i32_0 : i32, i32
  }
  func.func @transform_4(%arg0: i32) -> (i32, i32) {
    %c0_i32 = arith.constant 0 : i32
    %c0_i32_0 = arith.constant 0 : i32
    %c0_i32_1 = arith.constant 0 : i32
    return %c0_i32, %c0_i32_0 : i32, i32
  }
  func.func @transform_5(%arg0: i32) -> (i32, i32) {
    %c0_i32 = arith.constant 0 : i32
    %c0_i32_0 = arith.constant 0 : i32
    %c0_i32_1 = arith.constant 0 : i32
    return %c0_i32, %c0_i32_0 : i32, i32
  }
  func.func @transform_6(%arg0: i32) -> (i32, i32) {
    %c0_i32 = arith.constant 0 : i32
    %c0_i32_0 = arith.constant 0 : i32
    %c0_i32_1 = arith.constant 0 : i32
    return %c0_i32, %c0_i32_0 : i32, i32
  }
  func.func @transform_7(%arg0: i32) -> (i32, i32) {
    %c0_i32 = arith.constant 0 : i32
    %c0_i32_0 = arith.constant 0 : i32
    %c0_i32_1 = arith.constant 0 : i32
    return %c0_i32, %c0_i32_0 : i32, i32
  }
  func.func @transform_8(%arg0: i32) -> (i32, i32) {
    %c0_i32 = arith.constant 0 : i32
    %c0_i32_0 = arith.constant 0 : i32
    return %arg0, %c0_i32 : i32, i32
  }
}

</mosaic_0001>

<bundles_post_ra>
// kernel: tpu_custom_call.1
= control target key start
LH: loop header
LB: loop body
LE: loop exit
PB: predicated region body
PF: predicated region fallthrough
CT: control target
= control target key end

     0   :  { %13 = vsyncpa [#allocation3], 0  ;;  %s1253_s0 = inlined_call_operand.vmem [shape: f32[8,4], index: 0, kind: input, shape index: {}]   ;;  %s1254_s1 = inlined_call_operand.vmem [shape: f32[8,6], index: 1, kind: input, shape index: {}]   ;;  %s1255_s2 = inlined_call_operand.hbm [shape: f32[4,32], index: 2, kind: input, shape index: {}]   ;;  %s1256_s3 = inlined_call_operand.vmem [shape: f32[1,32], index: 3, kind: input, shape index: {}]   ;;  %s1257_s4 = inlined_call_operand.vmem [shape: f32[6,32], index: 4, kind: input, shape index: {}]   ;;  %s1258_s5 = inlined_call_operand.vmem [shape: f32[1,32], index: 5, kind: input, shape index: {}]   ;;  %s1259_s6 = inlined_call_operand.hbm [shape: f32[32,1024], index: 6, kind: input, shape index: {}]   ;;  %s1260_s7 = inlined_call_operand.hbm [shape: f32[32,1024], index: 7, kind: input, shape index: {}]   ;;  %s1261_s8 = inlined_call_operand.hbm [shape: f32[8,1024], index: 8, kind: output, shape index: {}]  }
   0x1   :  { %14 = vsyncpa [#allocation6], 0 }
   0x2   :  { %15 = vsyncpa [#allocation4], 0  ;;  %s1108_s27 = smov [#allocation5]   ;;  %s1014_s9 = scalar_lea.hbm %s1259_s6, 4096 }
   0x3   :  { %s41_s28 = sshll.u32 %s1108_s27, 4  ;;  %p1015_p0 = scmp.ne.s32.totalorder %s1259_s6, %s1014_s9  ;;  %s42_s28 = int_to_ptr.vmem [resolvable:$true] %s41_s28 }
   0x4   :  { %p1018_p1 = scmp.lt.u32.totalorder %s1014_s9, %s1259_s6 }
   0x6   :  { %p1020_p2 = pnand %p1018_p1, %p1015_p0 }
   0x8   :  { %1023 = shalt.err (!%p1020_p2)
}
   0x9   :  { %s1024_s14 = scalar_lea.vmem %s42_s28, 4096  ;;  %p1029_p4 = scmp.lt.s32.totalorder %s42_s28, %s42_s28 }
   0xa   :  { %p1025_p3 = scmp.ne.s32.totalorder %s42_s28, %s1024_s14  ;;  %p1030_p5 = scmp.lt.s32.totalorder %s1024_s14, %s1024_s14 }
   0xc   :  { %p1031_p6 = por %p1030_p5, %p1029_p4 }
   0xe   :  { %p1032_p7 = pnand %p1031_p6, %p1025_p3 }
  0x10   :  { %1035 = shalt.err (!%p1032_p7)
}
  0x11   :  { %s1109_s15 = smov 1024   ;;  %s1110_s16 = smov 64  }
  0x12   :  { %47 = dma.hbm_to_vmem [thread:$0]  %s1259_s6, 4096, %s42_s28, [#allocation6], %s1109_s15, %s1109_s15, %s1110_s16  }
  0x13   :  { %s1111_s19 = smov [#allocation2]   ;;  %s1112_s21 = smov [#allocation7]  }
  0x14   :  { %s26_s20 = sshll.u32 %s1111_s19, 4  ;;  %s53_s22 = sshll.u32 %s1112_s21, 4  ;;  %s27_s20 = int_to_ptr.vmem [resolvable:$true] %s26_s20  ;;  %s54_s22 = int_to_ptr.vmem [resolvable:$true] %s53_s22 }
  0x15   :  { %s1036_s25 = scalar_lea.hbm %s1255_s2, 64 }
  0x16   :  { %p1037_p8 = scmp.ne.s32.totalorder %s1255_s2, %s1036_s25  ;;  %p1040_p9 = scmp.lt.u32.totalorder %s1036_s25, %s1255_s2 }
  0x18   :  { %p1042_p10 = pnand %p1040_p9, %p1037_p8 }
  0x1a   :  { %1045 = shalt.err (!%p1042_p10)
}
  0x1b   :  { %s1046_s6 = scalar_lea.vmem %s27_s20, 64  ;;  %p1051_p12 = scmp.lt.s32.totalorder %s27_s20, %s27_s20 }
  0x1c   :  { %p1047_p11 = scmp.ne.s32.totalorder %s27_s20, %s1046_s6  ;;  %p1052_p13 = scmp.lt.s32.totalorder %s1046_s6, %s1046_s6 }
  0x1e   :  { %p1053_p0 = por %p1052_p13, %p1051_p12 }
  0x20   :  { %p1054_p1 = pnand %p1053_p0, %p1047_p11 }
  0x22   :  { %1057 = shalt.err (!%p1054_p1)
}
  0x23   :  { %29 = dma.hbm_to_vmem [thread:$0]  %s1255_s2, 64, %s27_s20, [#allocation3]  }
  0x24   :  { %s1058_s12 = scalar_lea.hbm %s1260_s7, 4096 }
  0x25   :  { %p1059_p2 = scmp.ne.s32.totalorder %s1260_s7, %s1058_s12  ;;  %p1062_p3 = scmp.lt.u32.totalorder %s1058_s12, %s1260_s7 }
  0x27   :  { %p1064_p4 = pnand %p1062_p3, %p1059_p2 }
  0x29   :  { %1067 = shalt.err (!%p1064_p4)
}
  0x2a   :  { %s1068_s19 = scalar_lea.vmem %s54_s22, 4096  ;;  %p1073_p6 = scmp.lt.s32.totalorder %s54_s22, %s54_s22 }
  0x2b   :  { %p1069_p5 = scmp.ne.s32.totalorder %s54_s22, %s1068_s19  ;;  %p1074_p7 = scmp.lt.s32.totalorder %s1068_s19, %s1068_s19 }
  0x2d   :  { %p1075_p8 = por %p1074_p7, %p1073_p6 }
  0x2f   :  { %p1076_p9 = pnand %p1075_p8, %p1069_p5 }
  0x31   :  { %1079 = shalt.err (!%p1076_p9)
}
  0x32   :  { %59 = dma.hbm_to_vmem [thread:$0]  %s1260_s7, 4096, %s54_s22, [#allocation6], %s1109_s15, %s1109_s15, %s1110_s16  }
  0x33   :  { %1102 = dma.done.wait [#allocation3], 64  }
  0x34   :  { %1103 = vsyncadd [#allocation3], 4294967232 }
  0x35   :  { %1104 = dma.done.wait [#allocation6], 8192  }
  0x36   :  { %1105 = vsyncadd [#allocation6], 4294959104  ;;  %v1113_v0 = vmov 0.0   ;;  %vm1114_vm0 = vmmov 0   ;;  %vm82_vm1 = vcmask 1043456   ;;  %vm169_vm2 = vcmask 1045504  }
  0x37   :  { %932 = vmatprep.subr.mxu0 %v1113_v0  ;;  %934 = vmatprep.mubr.msk.f32.mxu0 %vm1114_vm0, %v1113_v0  ;;  %vm78_vm3 = vcmask 31744   ;;  %vm165_vm4 = vcmask 48128   ;;  %v70_v1 = vld [vmem:[#allocation2] sm:$0xf]  ;;  %v69_v2 = vld [vmem:[%s1253_s0] sm:$0xff]  ;;  %v243_v10 = vld [vmem:[#allocation5] sm:$0xff] }
  0x38   :  { %937 = vmatprep.subr.mxu1 %v1113_v0  ;;  %939 = vmatprep.mubr.msk.f32.mxu1 %vm1114_vm0, %v1113_v0  ;;  %v157_v3 = vld [vmem:[%s1257_s4] sm:$0x3f]  ;;  %v246_v8 = vld [vmem:[#allocation5 + $0x18] sm:$0xff]  ;;  %v251_v12 = vld [vmem:[#allocation5 + $0x40] sm:$0xff]  ;;  %vm275_vm5 = vcmask 261120  }
  0x39   :  { %933 = vmatpush3.msk.msra.mxu0 %vm82_vm1, %v70_v1  ;;  %938 = vmatpush3.msk.msra.mxu1 %vm169_vm2, %v157_v3  ;;  %v156_v4 = vld [vmem:[%s1254_s1] sm:$0xff]  ;;  %v254_v9 = vld [vmem:[#allocation5 + $0x58] sm:$0xff]  ;;  %v944_v15 = vpack.c.bf16 %v251_v12, %v243_v10  ;;  %v259_v22 = vld [vmem:[#allocation5 + $0x80] sm:$0xff] }
  0x3a   :  { %v244_v5 = vld [vmem:[#allocation5 + $0x8] sm:$0xff]  ;;  %935 = vmatmul.mubr.msk.f32.vlgmr.msra.gmra.mrb[0].mxu0 %vm78_vm3, %v69_v2  ;;  %940 = vmatmul.mubr.msk.f32.vlgmr.msra.gmra.mrb[0].mxu1 %vm165_vm4, %v156_v4  ;;  %v950_v11 = vpack.c.bf16 %v254_v9, %v246_v8  ;;  %v245_v13 = vld [vmem:[#allocation5 + $0x10] sm:$0xff]  ;;  %v262_v19 = vld [vmem:[#allocation5 + $0x98] sm:$0xff] }
  0x3b   :  { %v252_v6 = vld [vmem:[#allocation5 + $0x48] sm:$0xff]  ;;  %v253_v14 = vld [vmem:[#allocation5 + $0x50] sm:$0xff]  ;;  %343 = vmatprep.mubr.f32.mxu0 %v1113_v0  ;;  %414 = vmatprep.mubr.f32.mxu1 %v1113_v0  ;;  %v270_v21 = vld [vmem:[#allocation5 + $0xd8] sm:$0xff] }
  0x3c   :  { %v942_v7 = vpack.c.bf16 %v252_v6, %v244_v5  ;;  %v952_v16 = vpack.c.bf16 %v253_v14, %v245_v13  ;;  %v260_v17 = vld [vmem:[#allocation5 + $0x88] sm:$0xff]  ;;  %951 = vmatprep.subr.bf16.mxu1 %v950_v11  ;;  %v267_v23 = vld [vmem:[#allocation5 + $0xc0] sm:$0xff]  ;;  %v954_v24 = vpack.c.bf16 %v270_v21, %v262_v19  ;;  %v261_v26 = vld [vmem:[#allocation5 + $0x90] sm:$0xff] }
  0x3d   :  { %v268_v18 = vld [vmem:[#allocation5 + $0xc8] sm:$0xff]  ;;  %v948_v25 = vpack.c.bf16 %v267_v23, %v259_v22  ;;  %v269_v27 = vld [vmem:[#allocation5 + $0xd0] sm:$0xff]  ;;  %v250_v31 = vld [vmem:[#allocation5 + $0x38] sm:$0xff] }
  0x3e   :  { %943 = vmatprep.subr.bf16.mxu0 %v942_v7  ;;  %v946_v20 = vpack.c.bf16 %v268_v18, %v260_v17  ;;  %953 = vmatpush1.bf16.msra.mxu1 %v952_v16  ;;  %v956_v28 = vpack.c.bf16 %v269_v27, %v261_v26  ;;  %v248_v29 = vld [vmem:[#allocation5 + $0x28] sm:$0xff]  ;;  %v258_v33 = vld [vmem:[#allocation5 + $0x78] sm:$0xff]  ;;  %v247_v36 = vld [vmem:[#allocation5 + $0x20] sm:$0xff] }
  0x3f   :  { %945 = vmatpush1.bf16.msra.mxu0 %v944_v15  ;;  %955 = vmatprep.subr.bf16.mxu1 %v954_v24  ;;  %v256_v30 = vld [vmem:[#allocation5 + $0x68] sm:$0xff]  ;;  %v966_v34 = vpack.c.bf16 %v258_v33, %v250_v31  ;;  %v255_v37 = vld [vmem:[#allocation5 + $0x60] sm:$0xff]  ;;  %v249_v38 = vld [vmem:[#allocation5 + $0x30] sm:$0xff] }
  0x40   :  { %947 = vmatprep.subr.bf16.mxu0 %v946_v20  ;;  %v958_v32 = vpack.c.bf16 %v256_v30, %v248_v29  ;;  %v914_v35 = vld [vmem:[%s1256_s3] ss:$0 sm:$0xff]  ;;  %v257_v39 = vld [vmem:[#allocation5 + $0x70] sm:$0xff]  ;;  %v266_v42 = vld [vmem:[#allocation5 + $0xb8] sm:$0xff]  ;;  %v960_v45 = vpack.c.bf16 %v255_v37, %v247_v36 }
  0x41   :  { %v264_v40 = vld [vmem:[#allocation5 + $0xa8] sm:$0xff]  ;;  %v274_v43 = vld [vmem:[#allocation5 + $0xf8] sm:$0xff]  ;;  %v968_v46 = vpack.c.bf16 %v257_v39, %v249_v38  ;;  %v263_v47 = vld [vmem:[#allocation5 + $0xa0] sm:$0xff] }
  0x42   :  { %957 = vmatpush1.bf16.msra.mxu1 %v956_v28  ;;  %v272_v41 = vld [vmem:[#allocation5 + $0xe8] sm:$0xff]  ;;  %v271_v48 = vld [vmem:[#allocation5 + $0xe0] sm:$0xff]  ;;  %v970_v53 = vpack.c.bf16 %v274_v43, %v266_v42  ;;  %v265_v54 = vld [vmem:[#allocation5 + $0xb0] sm:$0xff] }
  0x43   :  { %949 = vmatpush1.bf16.msra.mxu0 %v948_v25  ;;  %967 = vmatprep.subr.bf16.mxu1 %v966_v34  ;;  %v962_v52 = vpack.c.bf16 %v272_v41, %v264_v40  ;;  %v273_v55 = vld [vmem:[#allocation5 + $0xf0] sm:$0xff]  ;;  %v564_v56 = vld [vmem:[#allocation7 + $0x8] sm:$0xff]  ;;  %v566_v59 = vld [vmem:[#allocation7 + $0x18] sm:$0xff]  ;;  %v964_v61 = vpack.c.bf16 %v271_v48, %v263_v47 }
  0x44   :  { %959 = vmatprep.subr.bf16.mxu0 %v958_v32  ;;  %v572_v58 = vld [vmem:[#allocation7 + $0x48] sm:$0xff]  ;;  %v574_v60 = vld [vmem:[#allocation7 + $0x58] sm:$0xff]  ;;  %v972_v62 = vpack.c.bf16 %v273_v55, %v265_v54  ;;  %v563_v63 = vld [vmem:[#allocation7] sm:$0xff] }
  0x45   :  { %v571_v1 = vld [vmem:[#allocation7 + $0x40] sm:$0xff]  ;;  %v974_v2 = vpack.c.bf16 %v572_v58, %v564_v56  ;;  %v982_v3 = vpack.c.bf16 %v574_v60, %v566_v59  ;;  %v565_v4 = vld [vmem:[#allocation7 + $0x10] sm:$0xff]  ;;  %v580_v6 = vld [vmem:[#allocation7 + $0x88] sm:$0xff] }
  0x46   :  { %v573_v5 = vld [vmem:[#allocation7 + $0x50] sm:$0xff]  ;;  %v588_v7 = vld [vmem:[#allocation7 + $0xc8] sm:$0xff]  ;;  %v582_v8 = vld [vmem:[#allocation7 + $0x98] sm:$0xff]  ;;  %v976_v10 = vpack.c.bf16 %v571_v1, %v563_v63 }
  0x47   :  { %v590_v9 = vld [vmem:[#allocation7 + $0xd8] sm:$0xff]  ;;  %v984_v11 = vpack.c.bf16 %v573_v5, %v565_v4  ;;  %v579_v12 = vld [vmem:[#allocation7 + $0x80] sm:$0xff]  ;;  %v978_v14 = vpack.c.bf16 %v588_v7, %v580_v6  ;;  %v581_v16 = vld [vmem:[#allocation7 + $0x90] sm:$0xff] }
  0x48   :  { %v587_v13 = vld [vmem:[#allocation7 + $0xc0] sm:$0xff]  ;;  %v986_v15 = vpack.c.bf16 %v590_v9, %v582_v8  ;;  %v589_v17 = vld [vmem:[#allocation7 + $0xd0] sm:$0xff]  ;;  %v568_v18 = vld [vmem:[#allocation7 + $0x28] sm:$0xff] }
  0x49   :  { %v576_v19 = vld [vmem:[#allocation7 + $0x68] sm:$0xff]  ;;  %v570_v20 = vld [vmem:[#allocation7 + $0x38] sm:$0xff]  ;;  %v980_v23 = vpack.c.bf16 %v587_v13, %v579_v12  ;;  %v988_v24 = vpack.c.bf16 %v589_v17, %v581_v16  ;;  %v567_v25 = vld [vmem:[#allocation7 + $0x20] sm:$0xff] }
  0x4a   :  { %v578_v21 = vld [vmem:[#allocation7 + $0x78] sm:$0xff]  ;;  %v917_v22 = vld [vmem:[%s1258_s5] ss:$0 sm:$0xff]  ;;  %v575_v26 = vld [vmem:[#allocation7 + $0x60] sm:$0xff]  ;;  %v990_v27 = vpack.c.bf16 %v576_v19, %v568_v18  ;;  %s1115_s5 = smov [#allocation8]  }
  0x4b   :  { %v998_v28 = vpack.c.bf16 %v578_v21, %v570_v20  ;;  %v569_v29 = vld [vmem:[#allocation7 + $0x30] sm:$0xff]  ;;  %v584_v31 = vld [vmem:[#allocation7 + $0xa8] sm:$0xff]  ;;  %v586_v33 = vld [vmem:[#allocation7 + $0xb8] sm:$0xff]  ;;  %v992_v36 = vpack.c.bf16 %v575_v26, %v567_v25  ;;  %s904_s24 = sshll.u32 %s1115_s5, 4  ;;  %s905_s24 = int_to_ptr.vmem [resolvable:$true] %s904_s24 }
  0x4c   :  { %v577_v30 = vld [vmem:[#allocation7 + $0x70] sm:$0xff]  ;;  %v592_v32 = vld [vmem:[#allocation7 + $0xe8] sm:$0xff]  ;;  %v594_v34 = vld [vmem:[#allocation7 + $0xf8] sm:$0xff]  ;;  %s1080_s25 = scalar_lea.vmem %s905_s24, 1024  ;;  %p1085_p11 = scmp.lt.s32.totalorder %s905_s24, %s905_s24 }
  0x4d   :  { %v1000_v37 = vpack.c.bf16 %v577_v30, %v569_v29  ;;  %v583_v38 = vld [vmem:[#allocation7 + $0xa0] sm:$0xff]  ;;  %v994_v39 = vpack.c.bf16 %v592_v32, %v584_v31  ;;  %v1002_v40 = vpack.c.bf16 %v594_v34, %v586_v33  ;;  %v585_v42 = vld [vmem:[#allocation7 + $0xb0] sm:$0xff]  ;;  %p1081_p10 = scmp.ne.s32.totalorder %s905_s24, %s1080_s25  ;;  %p1086_p12 = scmp.lt.s32.totalorder %s1080_s25, %s1080_s25 }
  0x4e   :  { %v591_v41 = vld [vmem:[#allocation7 + $0xe0] sm:$0xff]  ;;  %v593_v43 = vld [vmem:[#allocation7 + $0xf0] sm:$0xff] }
  0x4f   :  { %p1087_p13 = por %p1086_p12, %p1085_p11 }
  0x51   :  { %p1088_p0 = pnand %p1087_p13, %p1081_p10 }
 0x10d   :  { %v152_v44 = vpop.f32.mrb[0].mxu0  ;;  %v1221_v49 = vpop.f32.mrb[0].mxu1 }
 0x10e   :  { %v153_v50 = vadd.f32 %v914_v35, %v152_v44  ;;  %v936_v51 = vpop.f32.mrb[1].mxu0  ;;  %v941_v57 = vpop.f32.mrb[1].mxu1  ;;  %v240_v35 = vadd.f32 %v917_v22, %v1221_v49  ;;  %v996_v44 = vpack.c.bf16 %v591_v41, %v583_v38 }
 0x110   :  { %920 = vmatmul.mubr.msk.f32.vlgmr.msra.gmra.mrb[2].mxu0 %vm275_vm5, %v153_v50  ;;  %921 = vmatmul.mubr.msk.f32.vlgmr.msra.gmra.mrb[2].mxu1 %vm275_vm5, %v153_v50 }
 0x111   :  { %961 = vmatpush1.bf16.msra.mxu0 %v960_v45  ;;  %969 = vmatpush1.bf16.msra.mxu1 %v968_v46  ;;  %v1004_v45 = vpack.c.bf16 %v593_v43, %v585_v42 }
 0x112   :  { %963 = vmatprep.subr.bf16.mxu0 %v962_v52  ;;  %971 = vmatprep.subr.bf16.mxu1 %v970_v53 }
 0x113   :  { %485 = vmatprep.mubr.f32.mxu0 %v1113_v0  ;;  %556 = vmatprep.mubr.f32.mxu1 %v1113_v0 }
 0x115   :  { %965 = vmatpush1.bf16.msra.mxu0 %v964_v61  ;;  %973 = vmatpush1.bf16.msra.mxu1 %v972_v62 }
 0x116   :  { %975 = vmatprep.subr.bf16.mxu0 %v974_v2  ;;  %983 = vmatprep.subr.bf16.mxu1 %v982_v3 }
 0x118   :  { %922 = vmatmul.mubr.msk.f32.vlgmr.msra.gmra.mrb[4].mxu0 %vm275_vm5, %v153_v50  ;;  %923 = vmatmul.mubr.msk.f32.vlgmr.msra.gmra.mrb[4].mxu1 %vm275_vm5, %v153_v50 }
 0x119   :  { %977 = vmatpush1.bf16.msra.mxu0 %v976_v10  ;;  %985 = vmatpush1.bf16.msra.mxu1 %v984_v11 }
 0x11a   :  { %979 = vmatprep.subr.bf16.mxu0 %v978_v14  ;;  %987 = vmatprep.subr.bf16.mxu1 %v986_v15 }
 0x11b   :  { %662 = vmatprep.mubr.f32.mxu0 %v1113_v0  ;;  %733 = vmatprep.mubr.f32.mxu1 %v1113_v0 }
 0x11d   :  { %981 = vmatpush1.bf16.msra.mxu0 %v980_v23  ;;  %989 = vmatpush1.bf16.msra.mxu1 %v988_v24 }
 0x11e   :  { %991 = vmatprep.subr.bf16.mxu0 %v990_v27  ;;  %999 = vmatprep.subr.bf16.mxu1 %v998_v28 }
 0x120   :  { %924 = vmatmul.mubr.msk.f32.vlgmr.msra.gmra.mrb[6].mxu0 %vm275_vm5, %v240_v35  ;;  %925 = vmatmul.mubr.msk.f32.vlgmr.msra.gmra.mrb[6].mxu1 %vm275_vm5, %v240_v35 }
 0x121   :  { %993 = vmatpush1.bf16.msra.mxu0 %v992_v36  ;;  %1001 = vmatpush1.bf16.msra.mxu1 %v1000_v37 }
 0x122   :  { %995 = vmatprep.subr.bf16.mxu0 %v994_v39  ;;  %1003 = vmatprep.subr.bf16.mxu1 %v1002_v40 }
 0x123   :  { %804 = vmatprep.mubr.f32.mxu0 %v1113_v0  ;;  %875 = vmatprep.mubr.f32.mxu1 %v1113_v0 }
 0x125   :  { %997 = vmatpush1.bf16.msra.mxu0 %v996_v44  ;;  %1005 = vmatpush1.bf16.msra.mxu1 %v1004_v45 }
 0x128   :  { %926 = vmatmul.mubr.msk.f32.vlgmr.msra.gmra.mrb[8].mxu0 %vm275_vm5, %v240_v35  ;;  %927 = vmatmul.mubr.msk.f32.vlgmr.msra.gmra.mrb[8].mxu1 %vm275_vm5, %v240_v35 }
 0x1e3   :  { %v345_v46 = vpop.f32.mrb[2].mxu0  ;;  %v416_v47 = vpop.f32.mrb[2].mxu1 }
 0x1e4   :  { %v347_v48 = vpop.f32.mrb[3].mxu0  ;;  %v418_v49 = vpop.f32.mrb[3].mxu1 }
 0x1eb   :  { %v487_v50 = vpop.f32.mrb[4].mxu0  ;;  %v558_v51 = vpop.f32.mrb[4].mxu1 }
 0x1ec   :  { %v489_v52 = vpop.f32.mrb[5].mxu0  ;;  %v560_v53 = vpop.f32.mrb[5].mxu1 }
 0x1f3   :  { %v664_v54 = vpop.f32.mrb[6].mxu0  ;;  %v735_v55 = vpop.f32.mrb[6].mxu1 }
 0x1f4   :  { %v882_v56 = vmul.f32 %v664_v54, %v345_v46  ;;  %v884_v57 = vmul.f32 %v735_v55, %v416_v47  ;;  %v666_v58 = vpop.f32.mrb[7].mxu0  ;;  %v737_v0 = vpop.f32.mrb[7].mxu1 }
 0x1f5   :  { %v883_v59 = vmul.f32 %v666_v58, %v347_v48  ;;  %v885_v60 = vmul.f32 %v737_v0, %v418_v49 }
 0x1f6   :  { %890 = vst [vmem:[#allocation8] sm:$0xff] %v882_v56  ;;  %892 = vst [vmem:[#allocation8 + $0x10] sm:$0xff] %v884_v57 }
 0x1f7   :  { %891 = vst [vmem:[#allocation8 + $0x8] sm:$0xff] %v883_v59  ;;  %893 = vst [vmem:[#allocation8 + $0x18] sm:$0xff] %v885_v60 }
 0x1fb   :  { %v806_v61 = vpop.f32.mrb[8].mxu0  ;;  %v877_v62 = vpop.f32.mrb[8].mxu1 }
 0x1fc   :  { %v886_v63 = vmul.f32 %v806_v61, %v487_v50  ;;  %v888_v1 = vmul.f32 %v877_v62, %v558_v51  ;;  %v808_v2 = vpop.f32.mrb[9].mxu0  ;;  %v879_v3 = vpop.f32.mrb[9].mxu1 }
 0x1fd   :  { %v887_v4 = vmul.f32 %v808_v2, %v489_v52  ;;  %v889_v5 = vmul.f32 %v879_v3, %v560_v53 }
 0x1fe   :  { %894 = vst [vmem:[#allocation8 + $0x20] sm:$0xff] %v886_v63  ;;  %896 = vst [vmem:[#allocation8 + $0x30] sm:$0xff] %v888_v1 }
 0x1ff   :  { %895 = vst [vmem:[#allocation8 + $0x28] sm:$0xff] %v887_v4  ;;  %897 = vst [vmem:[#allocation8 + $0x38] sm:$0xff] %v889_v5 }
 0x200   :  { %1091 = shalt.err (!%p1088_p0)
}
 0x201   :  { %s1092_s29 = scalar_lea.hbm %s1261_s8, 1024 }
 0x202   :  { %p1093_p1 = scmp.ne.s32.totalorder %s1261_s8, %s1092_s29  ;;  %p1096_p2 = scmp.lt.u32.totalorder %s1092_s29, %s1261_s8 }
 0x204   :  { %p1098_p3 = pnand %p1096_p2, %p1093_p1 }
 0x206   :  { %1101 = shalt.err (!%p1098_p3)
}
 0x207   :  { %907 = dma.vmem_to_hbm [thread:$0]  %s905_s24, 1024, %s1261_s8, [#allocation4]  }
 0x208   :  { %1106 = dma.done.wait [#allocation4], 1024  }
 0x209   :  { %1107 = vsyncadd [#allocation4], 4294966272 }
 0x20a   :  { %911 = vsyncpa [#allocation3], 1 }
 0x20b   :  { %912 = vsyncpa [#allocation6], 1 }
 0x20c   :  { %913 = vsyncpa [#allocation4], 1 }

</bundles_post_ra>
